<compile_context>
chip_gen: v6e
topology: v6e:2x2x1
jax: 0.10.0
libtpu: 0.0.40
codegen_flags: <defaults>
</compile_context>

<pallas_src>
import jax
import jax.numpy as jnp
from jax.experimental import pallas as pl
from jax.experimental.pallas import tpu as pltpu


def _se_kernel(x_ref, w1_ref, b1_ref, w2_ref, b2_ref, o_ref):
    # x_ref / o_ref: (n_tile, C, HW) in the storage dtype.
    x = x_ref[...]

    # ---- Squeeze: spatial sum with f32 accumulation (1/HW folded into w1). ----
    pooled = jnp.sum(x, axis=2, dtype=jnp.float32)                       # (n_tile, C)

    # ---- Excitation FC1 (C -> C_red) + ReLU, batched over n_tile (MXU). ----
    h = jnp.dot(pooled, w1_ref[...], preferred_element_type=jnp.float32) + b1_ref[...]
    h = jnp.maximum(h, 0.0)                                              # (n_tile, C_red)

    # ---- FC2 (C_red -> C) + hardsigmoid(x) = clip(0.2*x + 0.5, 0, 1). ----
    s = jnp.dot(h, w2_ref[...], preferred_element_type=jnp.float32) + b2_ref[...]
    s = jnp.clip(s * 0.2 + 0.5, 0.0, 1.0)                                # (n_tile, C) f32

    # ---- Recalibration in the storage dtype (no f32 upcast of the big tile). ----
    # v7x option if the small-HW lane path ever binds: repack (C,HW)->(HW,C) on
    # the XLU here, or pool via an MXU matmul against ones(HW, 1).
    o_ref[...] = x * s.astype(x.dtype)[:, :, None]


def _vmem_settings():
    """Per-generation (block_budget_bytes, vmem_limit_bytes)."""
    cap = None
    try:
        cap = getattr(pltpu.get_tpu_info(), "vmem_capacity_bytes", None)
    except Exception:
        cap = None
    if cap is None:
        cap = 64 * 1024 * 1024                       # assume worst case (v7x per-TC)
    if cap >= 100 * 1024 * 1024:                     # v5e / v6e: 128 MiB physical VMEM
        return 80 * 1024 * 1024, 100 * 1024 * 1024
    # v7x: 64 MiB per TC; leave headroom for compiler-internal scratch.
    return 36 * 1024 * 1024, 56 * 1024 * 1024


def squeeze_excitation(x_nchw, w1, b1, w2, b2, *, n_tile=None):
    """SE forward matching the PyTorch module.

    x_nchw: (N, C, H, W).
    w1: (C_red, C)  conv1 1x1 weight (kernel dims squeezed), b1: (C_red,)
    w2: (C, C_red)  conv2 1x1 weight (kernel dims squeezed), b2: (C,)
    Returns (N, C, H, W) in x's dtype; pool / FC math accumulates in f32.
    """
    N, C, H, W = x_nchw.shape
    HW = H * W
    C_red = w1.shape[0]
    itemsize = jnp.dtype(x_nchw.dtype).itemsize

    # HBM layout stays (N, C, HW) for every stage — no wrapper transposes.
    x = x_nchw.reshape(N, C, HW)

    block_budget, vmem_limit = _vmem_settings()

    # ---- n_tile: samples per grid step.  Double-buffered in+out ~= 4 blocks. ----
    per_sample_bytes = C * HW * itemsize
    max_tile = max(1, block_budget // (4 * per_sample_bytes))
    if n_tile is None:
        if N <= 1:
            n_tile = 1
        else:
            steps = max(2, int(pl.cdiv(N, max_tile)))   # >= 2 grid steps
            if steps % 2:                               # even steps: v7x 2-TC balance
                steps += 1
            n_tile = int(pl.cdiv(N, steps))
    grid = (int(pl.cdiv(N, n_tile)),)                   # last block may be partial

    # Weights pre-transposed to (in, out); the mean's 1/HW is folded into w1.
    w1t = (jnp.transpose(w1) / HW).astype(jnp.float32)  # (C, C_red)
    w2t = jnp.transpose(w2).astype(jnp.float32)         # (C_red, C)
    b1r = b1.reshape(1, C_red).astype(jnp.float32)
    b2r = b2.reshape(1, C).astype(jnp.float32)

    # Memory-bound: one read + one write of x; FC flops negligible.
    flops = int(N * (2 * C * HW + 4 * C * C_red))
    bytes_accessed = int(2 * N * C * HW * itemsize
                         + 4 * (w1t.size + w2t.size + b1r.size + b2r.size))

    out = pl.pallas_call(
        _se_kernel,
        out_shape=jax.ShapeDtypeStruct((N, C, HW), x.dtype),
        grid_spec=pltpu.PrefetchScalarGridSpec(
            num_scalar_prefetch=0,
            grid=grid,
            in_specs=[
                pl.BlockSpec((n_tile, C, HW), lambda b: (b, 0, 0)),   # x
                pl.BlockSpec((C, C_red), lambda b: (0, 0)),           # w1^T / HW
                pl.BlockSpec((1, C_red), lambda b: (0, 0)),           # b1
                pl.BlockSpec((C_red, C), lambda b: (0, 0)),           # w2^T
                pl.BlockSpec((1, C), lambda b: (0, 0)),               # b2
            ],
            out_specs=pl.BlockSpec((n_tile, C, HW), lambda b: (b, 0, 0)),
        ),
        compiler_params=pltpu.CompilerParams(
            dimension_semantics=("parallel",),
            vmem_limit_bytes=vmem_limit,
        ),
        cost_estimate=pl.CostEstimate(
            flops=flops, transcendentals=0, bytes_accessed=bytes_accessed),
    )(x, w1t, b1r, w2t, b2r)

    return out.reshape(N, C, H, W)


def _reference(x, w1, b1, w2, b2):
    """Pure-JAX reference matching the PyTorch forward (slope-0.2 hardsigmoid)."""
    pooled = jnp.mean(x, axis=(2, 3), keepdims=True)                          # (N,C,1,1)
    h = jnp.einsum('rc,nchw->nrhw', w1, pooled) + b1[None, :, None, None]
    h = jnp.maximum(h, 0.0)
    s = jnp.einsum('cr,nrhw->nchw', w2, h) + b2[None, :, None, None]
    s = jnp.clip(s * 0.2 + 0.5, 0.0, 1.0)
    return x * s


def _make_params(keys, C, C_red):
    k_w1, k_b1, k_w2, k_b2 = keys
    w1 = 0.1 * jax.random.normal(k_w1, (C_red, C), dtype=jnp.float32)
    b1 = 0.1 * jax.random.normal(k_b1, (C_red,), dtype=jnp.float32)
    w2 = 0.1 * jax.random.normal(k_w2, (C, C_red), dtype=jnp.float32)
    b2 = 0.1 * jax.random.normal(k_b2, (C,), dtype=jnp.float32)
    return w1, b1, w2, b2


if __name__ == "__main__":
    key = jax.random.PRNGKey(0)
    keys = jax.random.split(key, 15)

    # ---- Test 1: large spatial stage (HW = 256) ----
    N, C, H, W = 2, 8, 16, 16
    C_red = C // 4
    x = jax.random.normal(keys[0], (N, C, H, W), dtype=jnp.float32)
    w1, b1, w2, b2 = _make_params(keys[1:5], C, C_red)

    out = squeeze_excitation(x, w1, b1, w2, b2)
    jax.block_until_ready(out)
    ref = _reference(x, w1, b1, w2, b2)
    assert out.shape == (N, C, H, W)
    assert jnp.allclose(out, ref, atol=1e-5, rtol=1e-5)

    # ---- Test 2: small spatial / wide channel stage (HW = 49, C = 128) ----
    N2, C2, H2, W2 = 4, 128, 7, 7
    C2_red = C2 // 4
    x2 = jax.random.normal(keys[5], (N2, C2, H2, W2), dtype=jnp.float32)
    w1b, b1b, w2b, b2b = _make_params(keys[6:10], C2, C2_red)

    out2 = squeeze_excitation(x2, w1b, b1b, w2b, b2b)
    jax.block_until_ready(out2)
    ref2 = _reference(x2, w1b, b1b, w2b, b2b)
    assert out2.shape == (N2, C2, H2, W2)
    assert jnp.allclose(out2, ref2, atol=1e-5, rtol=1e-5)

    # ---- Test 3: odd batch (exercises the cdiv partial last block) ----
    N3, C3, H3, W3 = 3, 16, 7, 7
    C3_red = C3 // 4
    x3 = jax.random.normal(keys[10], (N3, C3, H3, W3), dtype=jnp.float32)
    w1c, b1c, w2c, b2c = _make_params(keys[11:15], C3, C3_red)

    out3 = squeeze_excitation(x3, w1c, b1c, w2c, b2c)
    jax.block_until_ready(out3)
    ref3 = _reference(x3, w1c, b1c, w2c, b2c)
    assert out3.shape == (N3, C3, H3, W3)
    assert jnp.allclose(out3, ref3, atol=1e-5, rtol=1e-5)

    print("KERNEL_OK")
</pallas_src>

<mosaic_0001>
module attributes {stable_mosaic.version = 11 : i64} {
  func.func @_se_kernel(%arg0: i32, %arg1: memref<1x8x256xf32, #tpu.memory_space<vmem>>, %arg2: memref<8x2xf32, #tpu.memory_space<vmem>>, %arg3: memref<1x2xf32, #tpu.memory_space<vmem>>, %arg4: memref<2x8xf32, #tpu.memory_space<vmem>>, %arg5: memref<1x8xf32, #tpu.memory_space<vmem>>, %arg6: memref<1x8x256xf32, #tpu.memory_space<vmem>>) attributes {dimension_semantics = [#tpu.dimension_semantics<parallel>], iteration_bounds = array<i64: 2>, scalar_prefetch = 0 : i64, scratch_operands = 0 : i64, tpu.core_type = #tpu.core_type<tc>, window_params = [{transform_indices = @transform_0, window_bounds = array<i64: 1, 8, 256>}, {pipeline_mode = #tpu.pipeline_mode<synchronous>, transform_indices = @transform_1, window_bounds = array<i64: 8, 2>}, {pipeline_mode = #tpu.pipeline_mode<synchronous>, transform_indices = @transform_2, window_bounds = array<i64: 1, 2>}, {pipeline_mode = #tpu.pipeline_mode<synchronous>, transform_indices = @transform_3, window_bounds = array<i64: 2, 8>}, {pipeline_mode = #tpu.pipeline_mode<synchronous>, transform_indices = @transform_4, window_bounds = array<i64: 1, 8>}, {transform_indices = @transform_5, window_bounds = array<i64: 1, 8, 256>}]} {
    %c0 = arith.constant 0 : index
    %c0_0 = arith.constant 0 : index
    %c0_1 = arith.constant 0 : index
    %0 = vector.load %arg1[%c0, %c0_0, %c0_1] : memref<1x8x256xf32, #tpu.memory_space<vmem>>, vector<1x8x256xf32>
    %cst = arith.constant dense<0.000000e+00> : vector<1x8xf32>
    %1 = vector.multi_reduction <add>, %0, %cst [2] : vector<1x8x256xf32> to vector<1x8xf32>
    %c0_2 = arith.constant 0 : index
    %c0_3 = arith.constant 0 : index
    %2 = vector.load %arg2[%c0_2, %c0_3] : memref<8x2xf32, #tpu.memory_space<vmem>>, vector<8x2xf32>
    %cst_4 = arith.constant dense<0.000000e+00> : vector<1x2xf32>
    %3 = tpu.matmul %1, %2, %cst_4 {dimension_numbers = #tpu.dot_dimension_numbers<[1], [0], [0], [1], [0, 0, 1, 1], [], []>} : vector<1x8xf32>, vector<8x2xf32>, vector<1x2xf32> -> vector<1x2xf32>
    %c0_5 = arith.constant 0 : index
    %c0_6 = arith.constant 0 : index
    %4 = vector.load %arg3[%c0_5, %c0_6] : memref<1x2xf32, #tpu.memory_space<vmem>>, vector<1x2xf32>
    %5 = arith.addf %3, %4 : vector<1x2xf32>
    %cst_7 = arith.constant 0.000000e+00 : f32
    %6 = vector.broadcast %cst_7 : f32 to vector<1x2xf32>
    %7 = arith.maximumf %5, %6 : vector<1x2xf32>
    %c0_8 = arith.constant 0 : index
    %c0_9 = arith.constant 0 : index
    %8 = vector.load %arg4[%c0_8, %c0_9] : memref<2x8xf32, #tpu.memory_space<vmem>>, vector<2x8xf32>
    %cst_10 = arith.constant dense<0.000000e+00> : vector<1x8xf32>
    %9 = tpu.matmul %7, %8, %cst_10 {dimension_numbers = #tpu.dot_dimension_numbers<[1], [0], [0], [1], [0, 0, 1, 1], [], []>} : vector<1x2xf32>, vector<2x8xf32>, vector<1x8xf32> -> vector<1x8xf32>
    %c0_11 = arith.constant 0 : index
    %c0_12 = arith.constant 0 : index
    %10 = vector.load %arg5[%c0_11, %c0_12] : memref<1x8xf32, #tpu.memory_space<vmem>>, vector<1x8xf32>
    %11 = arith.addf %9, %10 : vector<1x8xf32>
    %cst_13 = arith.constant 2.000000e-01 : f32
    %12 = vector.broadcast %cst_13 : f32 to vector<1x8xf32>
    %13 = arith.mulf %11, %12 : vector<1x8xf32>
    %cst_14 = arith.constant 5.000000e-01 : f32
    %14 = vector.broadcast %cst_14 : f32 to vector<1x8xf32>
    %15 = arith.addf %13, %14 : vector<1x8xf32>
    %cst_15 = arith.constant 0.000000e+00 : f32
    %cst_16 = arith.constant 1.000000e+00 : f32
    %16 = vector.broadcast %cst_15 : f32 to vector<1x8xf32>
    %17 = arith.maximumf %16, %15 : vector<1x8xf32>
    %18 = vector.broadcast %cst_16 : f32 to vector<1x8xf32>
    %19 = arith.minimumf %18, %17 : vector<1x8xf32>
    %20 = vector.shape_cast %19 : vector<1x8xf32> to vector<1x8x1xf32>
    %21 = vector.broadcast %20 : vector<1x8x1xf32> to vector<1x8x256xf32>
    %22 = arith.mulf %0, %21 : vector<1x8x256xf32>
    %c0_17 = arith.constant 0 : index
    %c0_18 = arith.constant 0 : index
    %c0_19 = arith.constant 0 : index
    %23 = vector.load %arg6[%c0_17, %c0_18, %c0_19] : memref<1x8x256xf32, #tpu.memory_space<vmem>>, vector<1x8x256xf32>
    tpu.vector_store %arg6[%c0_17, %c0_18, %c0_19], %22 {strides = array<i32>} : memref<1x8x256xf32, #tpu.memory_space<vmem>>, vector<1x8x256xf32>,
    return
  }
  func.func @transform_0(%arg0: i32) -> (i32, i32, i32) {
    %c0_i32 = arith.constant 0 : i32
    %c0_i32_0 = arith.constant 0 : i32
    %c0_i32_1 = arith.constant 0 : i32
    return %arg0, %c0_i32, %c0_i32_0 : i32, i32, i32
  }
  func.func @transform_1(%arg0: i32) -> (i32, i32) {
    %c0_i32 = arith.constant 0 : i32
    %c0_i32_0 = arith.constant 0 : i32
    %c0_i32_1 = arith.constant 0 : i32
    return %c0_i32, %c0_i32_0 : i32, i32
  }
  func.func @transform_2(%arg0: i32) -> (i32, i32) {
    %c0_i32 = arith.constant 0 : i32
    %c0_i32_0 = arith.constant 0 : i32
    %c0_i32_1 = arith.constant 0 : i32
    return %c0_i32, %c0_i32_0 : i32, i32
  }
  func.func @transform_3(%arg0: i32) -> (i32, i32) {
    %c0_i32 = arith.constant 0 : i32
    %c0_i32_0 = arith.constant 0 : i32
    %c0_i32_1 = arith.constant 0 : i32
    return %c0_i32, %c0_i32_0 : i32, i32
  }
  func.func @transform_4(%arg0: i32) -> (i32, i32) {
    %c0_i32 = arith.constant 0 : i32
    %c0_i32_0 = arith.constant 0 : i32
    %c0_i32_1 = arith.constant 0 : i32
    return %c0_i32, %c0_i32_0 : i32, i32
  }
  func.func @transform_5(%arg0: i32) -> (i32, i32, i32) {
    %c0_i32 = arith.constant 0 : i32
    %c0_i32_0 = arith.constant 0 : i32
    %c0_i32_1 = arith.constant 0 : i32
    return %arg0, %c0_i32, %c0_i32_0 : i32, i32, i32
  }
}

</mosaic_0001>

<bundles_post_ra>
// kernel: tpu_custom_call.1
= control target key start
LH: loop header
LB: loop body
LE: loop exit
PB: predicated region body
PF: predicated region fallthrough
CT: control target
= control target key end

     0   :  { %10 = vsyncpa [#allocation3], 0  ;;  %s881_s0 = inlined_call_operand.hbm [shape: f32[2,8,256], index: 0, kind: input, shape index: {}]   ;;  %s882_s1 = inlined_call_operand.vmem [shape: f32[8,2], index: 1, kind: input, shape index: {}]   ;;  %s883_s2 = inlined_call_operand.vmem [shape: f32[1,2], index: 2, kind: input, shape index: {}]   ;;  %s884_s3 = inlined_call_operand.vmem [shape: f32[2,8], index: 3, kind: input, shape index: {}]   ;;  %s885_s4 = inlined_call_operand.vmem [shape: f32[1,8], index: 4, kind: input, shape index: {}]   ;;  %s886_s5 = inlined_call_operand.hbm [shape: f32[2,8,256], index: 5, kind: output, shape index: {}]  }
   0x1   :  { %12 = vsyncpa [#allocation3 + $0x1], 0 }
   0x2   :  { %13 = vsyncpa [#allocation4], 0 }
   0x3   :  { %15 = vsyncpa [#allocation4 + $0x1], 0  ;;  %s718_s18 = smov 0   ;;  %s720_s19 = smov 0  }
   0x4   :  { %s722_s20 = smov 0   ;;  %s724_s21 = smov 0  }
   0x5 LB: > { %s739_s22 = sadd.s32 4294967295, %s682_s21   ;;  %s509_s23 = sadd.s32 4294967294, %s682_s21   ;;  %s682_s21 = sphi %s724_s21, %s903_s21   ;;  %s678_s20 = sphi %s722_s20, %s902_s20   ;;  %s674_s19 = sphi %s720_s19, %s901_s19   ;;  %s670_s18 = sphi %s718_s18, %s900_s18  }
   0x6   : > { %s743_s24 = sadd.s32 1, %s682_s21   ;;  %s28_s25 = sadd.s32 1, %s678_s20 }
   0x7   : > { %s25_s26 = ssub.s32 %s682_s21, %s743_s24  ;;  %p35_p0 = scmp.ne.s32.totalorder %s678_s20, %s674_s19 }
   0x8   : > { %p26_p1 = scmp.eq.s32.totalorder %s25_s26, 0  ;;  %p36_p2 = scmp.eq.s32.totalorder %s682_s21, 0 }
   0x9   : > { %p41_p3 = scmp.ne.s32.totalorder %s674_s19, %s670_s18  ;;  %p42_p4 = scmp.eq.s32.totalorder %s739_s22, 0 }
   0xa   : > { %s755_s27 = scalar_select %p26_p1, %s678_s20, %s28_s25  }
   0xb   : > { %p757_p5 = por %p36_p2, %p35_p0  ;;  %p761_p6 = por %p42_p4, %p41_p3 }
   0xc   : > { %p149_p7 = scmp.eq.s32.totalorder %s739_s22, 1  ;;  %p155_p8 = scmp.eq.s32.totalorder %s509_s23, 1 }
   0xd   : > { %s890_s29 = scalar_select %p761_p6, 1, 0 }
   0xe   : > { %p554_p10 = scmp.lt.s32.totalorder %s682_s21, 2  ;;  %p768_p11 = por %p149_p7, %p35_p0 }
   0xf   : > { %p772_p12 = por %p155_p8, %p41_p3  ;;  %s187_s7 = sand.u32 1, %s678_s20  }
  0x10   : > { %s891_s30 = scalar_select %p768_p11, 1, 0 }
  0x11   : > { %s892_s6 = scalar_select %p772_p12, 1, 0 }
  0x12   : > { %s526_s8 = sshll.u32 %s682_s21, 8  ;;  %s512_s9 = sshll.u32 %s187_s7, 4 }
  0x13   : > { %s781_s12 = scalar_lea.hbm %s881_s0, %s526_s8  ;;  %s191_s13 = scalar_lea.vmem [#allocation2], %s512_s9 }
  0x14   : > { %s199_s14 = sshll.u32 %s191_s13, 4  ;;  %p785_p13 = pnand %p554_p10, %p757_p5  ;;  %s789_s14 = int_to_ptr.vmem [resolvable:$true] %s199_s14 }
  0x15   : > { %s188_s16 = scalar_lea.sflag [#allocation3], %s187_s7  ;;  %s590_s17 = scalar_lea.hbm %s781_s12, 256 }
  0x16   : > { %p591_p2 = scmp.ne.s32.totalorder %s781_s12, %s590_s17  ;;  %p592_p3 = pneg %p785_p13 }
  0x17   : > { %s595_s26 = scalar_lea.hbm %s881_s0, 512  ;;  %p596_p5 = scmp.lt.s32.totalorder %s781_s12, %s881_s0 }
  0x18   : > { %p593_p4 = pnand %p592_p3, %p591_p2  ;;  %p597_p8 = scmp.lt.s32.totalorder %s595_s26, %s590_s17 }
  0x1a   : > { %p594_p7 = pneg %p593_p4  ;;  %p598_p10 = por %p597_p8, %p596_p5 }
  0x1c   : > { %p599_p9 = pnand %p598_p10, %p594_p7 }
  0x1e   : > { %602 = shalt.err (!%p599_p9)
}
  0x1f   : > { %s603_s7 = scalar_lea.vmem %s789_s14, 256  ;;  %s684_s9 = smov [#allocation2]  }
  0x20   : > { %p604_p0 = scmp.ne.s32.totalorder %s789_s14, %s603_s7  ;;  %s608_s10 = sshll.u32 %s684_s9, 4  ;;  %s609_s10 = int_to_ptr.vmem [resolvable:$false] %s608_s10 }
  0x21   : > { %s610_s11 = scalar_lea.vmem %s609_s10, 512  ;;  %p611_p4 = scmp.lt.s32.totalorder %s789_s14, %s609_s10 }
  0x22   : > { %p606_p1 = pnand %p604_p0, %p592_p3  ;;  %p612_p12 = scmp.lt.s32.totalorder %s610_s11, %s603_s7 }
  0x24   : > { %p607_p2 = pneg %p606_p1  ;;  %p613_p11 = por %p612_p12, %p611_p4 }
  0x26   : > { %p614_p6 = pnand %p613_p11, %p607_p2 }
  0x28   : > { %617 = shalt.err (!%p614_p6)
}
  0x29   : > { %549 = dma.hbm_to_vmem [thread:$0]  (!%p785_p13), %s781_s12, 256, %s789_s14, %s188_s16  }
  0x2a   : > { %p894_p9 = scmp.lt.s32.totalorder %s682_s21, 3  ;;  %p895_p7 = scmp.ge.s32.totalorder %s682_s21, 1 }
  0x2c   : > { %p205_p0 = pnand %p895_p7, %p894_p9 }
  0x2d   : > { %s816_s13 = sand.u32 (!%p205_p0), 1, %s674_s19   ;;  %p896_p6 = scmp.ne.s32.totalorder (!%p205_p0), %s890_s29, 0 }
  0x2e   : > { %208 = sbr.rel (%p205_p0) target bundleno = 727 (0x2d7), region = 40  ;;  %s516_s17 = sshll.u32 (!%p205_p0), %s816_s13, 4 }
  0x2f   : > { %s211_s23 = scalar_lea.sflag (!%p205_p0), [#allocation3], %s816_s13  ;;  %s214_s15 = scalar_lea.vmem (!%p205_p0), [#allocation2], %s516_s17 }
  0x33   : > { %661 = dma.done.wait (%p896_p6), %s211_s23, 256  }
  0x34   : > { %663 = vsyncadd (%p896_p6), %s211_s23, 4294967040  ;;  %v241_v0 = vld [vmem:[%s214_s15] sm:$0xff]  ;;  %v242_v1 = vld [vmem:[%s214_s15 + $0x8] sm:$0xff]  ;;  %v685_v3 = vmov 0.0   ;;  %vm686_vm0 = vmmov 0   ;;  %v249_v5 = vlaneseq  ;;  %vm255_vm1 = vcmask 64512  }
  0x35   : > { %v243_v2 = vadd.f32 %v242_v1, %v241_v0  ;;  %532 = vmatprep.subr.mxu0 %v685_v3  ;;  %v246_v4 = vld [vmem:[%s882_s1] sm:$0xff]  ;;  %537 = vmatprep.subr.mxu1 %v685_v3  ;;  %vm335_vm2 = vcmask 1041408   ;;  %vm331_vm3 = vcmask 15360   ;;  %s527_s7 = sshll.u32 %s739_s22, 8  ;;  %s240_s9 = scalar_lea.vmem [#allocation5], %s516_s17 }
  0x36   : > { %533 = vmatpush3.msra.mxu0 %v246_v4  ;;  %534 = vmatprep.mubr.msk.f32.mxu0 %vm686_vm0, %v685_v3  ;;  %v250_v6 = vand.u32 127, %v249_v5  ;;  %v252_v7 = vshrl.u32 %v249_v5, 7  ;;  %v329_v11 = vld [vmem:[%s884_s3] sm:$0x3]  ;;  %s439_s10 = sshll.u32 %s240_s9, 4  ;;  %s844_s15 = scalar_lea.hbm %s886_s5, %s527_s7  ;;  %s440_s10 = int_to_ptr.vmem [resolvable:$true] %s439_s10 }
  0x37   : > { %244 = vadd.xlane.f32.xlu0 %v243_v2  ;;  %539 = vmatprep.mubr.msk.f32.mxu1 %vm686_vm0, %v685_v3  ;;  %v247_v12 = vld [vmem:[%s883_s2] sm:$0x1]  ;;  %s425_s12 = scalar_lea.sflag [#allocation4], %s816_s13  ;;  %s618_s14 = scalar_lea.vmem %s440_s10, 256 }
  0x38   : > { %v253_v8 = vsub.s32 %v250_v6, %v252_v7  ;;  %538 = vmatpush3.msk.msra.mxu1 %vm335_vm2, %v329_v11  ;;  %v330_v17 = vld [vmem:[%s885_s4] sm:$0x1]  ;;  %v415_v24 = vsub.s32 0, %v252_v7  ;;  %p619_p11 = scmp.ne.s32.totalorder %s440_s10, %s618_s14  ;;  %p897_p12 = scmp.ne.s32.totalorder %s891_s30, 0 }
  0x39   : > { %s687_s22 = smov [#allocation5]  }
  0x3a   : > { %p620_p13 = pnand %p619_p11, %p897_p12  ;;  %s622_s17 = sshll.u32 %s687_s22, 4  ;;  %s623_s17 = int_to_ptr.vmem [resolvable:$false] %s622_s17 }
  0x3b   : > { %s624_s29 = scalar_lea.vmem %s623_s17, 512  ;;  %p625_p3 = scmp.lt.s32.totalorder %s440_s10, %s623_s17 }
  0x3c   : > { %p621_p1 = pneg %p620_p13  ;;  %p626_p5 = scmp.lt.s32.totalorder %s624_s29, %s618_s14 }
  0x3e   : > { %p627_p8 = por %p626_p5, %p625_p3 }
  0x40   : > { %p628_p10 = pnand %p627_p8, %p621_p1 }
  0xc0   : > { %v245_v9 = vpop.xlane.xlu0 %244 }
  0xc1   : > { %v254_v10 = vrot.slane %v245_v9, %v253_v8 }
  0xc3   : > { %535 = vmatmul.mubr.msk.f32.vlgmr.msra.gmra.mxu0 %vm255_vm1, %v254_v10 }
 0x183   : > { %v324_v13 = vpop.f32.mrf.mxu0 }
 0x184   : > { %v325_v14 = vadd.f32 %v324_v13, %v247_v12 }
 0x185   : > { %v536_v15 = vpop.f32.mrf.mxu0 }
 0x186   : > { %v328_v16 = vmax.f32 %v325_v14, 0.0 }
 0x188   : > { %540 = vmatmul.mubr.msk.f32.vlgmr.msra.gmra.mxu1 %vm331_vm3, %v328_v16 }
 0x248   : > { %v405_v18 = vpop.f32.mrf.mxu1 }
 0x249   : > { %v406_v19 = vadd.f32 %v405_v18, %v330_v17 }
 0x24a   : > { %v541_v20 = vpop.f32.mrf.mxu1 }
 0x24b   : > { %v409_v21 = vmul.f32 0.2, %v406_v19 }
 0x24d   : > { %v410_v22 = vadd.f32 0.5, %v409_v21 }
 0x24f   : > { %v411_v23 = vmax.f32 %v410_v22, 0.0 }
 0x251   : > { %v412_v25 = vmin.f32 %v411_v23, 1.0 }
 0x253   : > { %v416_v26 = vrot.slane %v412_v25, %v415_v24 }
 0x255   : > { %418 = vbcast.lane.b32.xlu0 %v416_v26, 256 }
 0x2c7   : > { %v419_v27 = vpop.permute.xlu0 %418 }
 0x2c8   : > { %v420_v28 = vmul.f32 %v419_v27, %v241_v0  ;;  %v421_v29 = vmul.f32 %v419_v27, %v242_v1 }
 0x2ca   : > { %422 = vst [vmem:[%s240_s9] sm:$0xff] %v420_v28  ;;  %423 = vst [vmem:[%s240_s9 + $0x8] sm:$0xff] %v421_v29 }
 0x2cb   : > { %631 = shalt.err (!%p628_p10)
}
 0x2cc   : > { %s632_s16 = scalar_lea.hbm %s844_s15, 256  ;;  %s636_s26 = scalar_lea.hbm %s886_s5, 512 }
 0x2cd   : > { %p633_p2 = scmp.ne.s32.totalorder %s844_s15, %s632_s16  ;;  %p637_p7 = scmp.lt.s32.totalorder %s844_s15, %s886_s5 }
 0x2ce   : > { %p638_p0 = scmp.lt.s32.totalorder %s636_s26, %s632_s16 }
 0x2cf   : > { %p634_p4 = pnand %p633_p2, %p897_p12 }
 0x2d0   : > { %p639_p6 = por %p638_p0, %p637_p7 }
 0x2d1   : > { %p635_p9 = pneg %p634_p4 }
 0x2d3   : > { %p640_p11 = pnand %p639_p6, %p635_p9 }
 0x2d5   : > { %643 = shalt.err (!%p640_p11)
}
 0x2d6   : > { %544 = dma.vmem_to_hbm [thread:$0]  (%p897_p12), %s440_s10, 256, %s844_s15, %s425_s12  }
 0x2d7 PF: > { %s451_s7 = sand.u32 1, %s670_s18   ;;  %p898_p13 = scmp.ne.s32.totalorder %s892_s6, 0 }
 0x2d8   : > { %p899_p1 = scmp.ge.s32.totalorder %s682_s21, 2  ;;  %s452_s9 = scalar_lea.sflag [#allocation4], %s451_s7 }
 0x2da   : > { %p551_p3 = pnand %p899_p1, %p898_p13 }
 0x2dc   : > { %p552_p5 = pneg %p551_p3 }
 0x2de   : > { %665 = dma.done.wait (%p552_p5), %s452_s9, 256  }
 0x2df   : > { %667 = vsyncadd (%p552_p5), %s452_s9, 4294967040  ;;  %p18_p8 = scmp.ge.s32.totalorder %s743_s24, 4   ;;  %s900_s18 = smov %s674_s19 }
 0x2e0   : > { %s901_s19 = smov %s678_s20  ;;  %s902_s20 = smov %s755_s27 }
 0x2e1   : > { %s903_s21 = smov %s743_s24  ;;  %20 = sbr.rel (!%p18_p8) target bundleno = 5 (0x5), region = 85 }
 0x2e6   :  { %457 = vsyncpa [#allocation3], 1 }
 0x2e7   :  { %459 = vsyncpa [#allocation3 + $0x1], 1 }
 0x2e8   :  { %460 = vsyncpa [#allocation4], 1 }
 0x2e9   :  { %462 = vsyncpa [#allocation4 + $0x1], 1 }

</bundles_post_ra>
